<compile_context>
chip_gen: v7x
topology: tpu7x:2x2x1
jax: 0.10.0
libtpu: 0.0.40
codegen_flags: <defaults>
</compile_context>

<pallas_src>
import jax
import jax.numpy as jnp
from jax.experimental import pallas as pl
from jax.experimental.pallas import tpu as pltpu

FLOAT_EPS = float(jnp.finfo(jnp.float32).eps)

_LANE_WIDTH = 512        # lane-dense slab width (multiple of 128)
_MAX_TILE_ROWS = 1024    # rows per grid step (multiple of 8); 1024x512 f32 = 2 MiB


def _make_scaler_kernel(min_val, max_val):
    min_val = float(min_val)
    max_val = float(max_val)

    def scaler_kernel(alpha_ref, x_ref, o_ref):
        # alpha_ref: SMEM scalar (shape (1,)); x_ref/o_ref: VMEM (TM, LW) tiles.
        # Exact scalar reciprocal, hoisted off the vector path (computed once
        # per grid step on the scalar unit, negligible).
        inv_a = 1.0 / jnp.maximum(alpha_ref[0], FLOAT_EPS)
        y = x_ref[...].astype(jnp.float32) * inv_a
        o_ref[...] = jnp.clip(y, min_val, max_val).astype(o_ref.dtype)

    return scaler_kernel


def scaler_forward(x, alpha, *, min_val=0.0, max_val=1.0):
    """x: (B, T, C) array, alpha: (1, 1, 1) parameter (scalar)."""
    orig_shape = x.shape
    n = x.size

    # --- lane-dense slab: flatten and pad to a multiple of the lane width ---
    lw = _LANE_WIDTH
    n_pad = int(pl.cdiv(n, lw)) * lw
    xf = x.reshape(-1)
    if n_pad != n:
        xf = jnp.pad(xf, (0, n_pad - n))
    m_rows = n_pad // lw
    x2d = xf.reshape(m_rows, lw)

    # --- row tiling: full extent for small inputs, 1024-row tiles otherwise ---
    tm = m_rows if m_rows <= _MAX_TILE_ROWS else _MAX_TILE_ROWS
    grid = (int(pl.cdiv(m_rows, tm)),)

    alpha_flat = alpha.reshape(1).astype(jnp.float32)
    kernel = _make_scaler_kernel(min_val, max_val)

    elem_bytes = jnp.dtype(x.dtype).itemsize
    cost = pl.CostEstimate(
        flops=3 * n,                      # mul + min + max per element
        transcendentals=0,
        bytes_accessed=2 * n * elem_bytes,
    )

    out2d = pl.pallas_call(
        kernel,
        out_shape=jax.ShapeDtypeStruct((m_rows, lw), x.dtype),
        grid_spec=pltpu.PrefetchScalarGridSpec(
            num_scalar_prefetch=0,
            grid=grid,
            in_specs=[
                pl.BlockSpec(memory_space=pltpu.MemorySpace.SMEM),  # alpha scalar
                pl.BlockSpec((tm, lw), lambda i: (i, 0)),           # x tile
            ],
            out_specs=pl.BlockSpec((tm, lw), lambda i: (i, 0)),
        ),
        compiler_params=pltpu.CompilerParams(
            dimension_semantics=("parallel",),  # embarrassingly parallel (2 TCs on v7x)
        ),
        cost_estimate=cost,
    )(alpha_flat, x2d)

    # Trim padding and restore the original layout.
    return out2d.reshape(-1)[:n].reshape(orig_shape)


if __name__ == "__main__":
    key = jax.random.PRNGKey(0)
    B, T, C = 2, 8, 32

    # Deterministic parameter init, matching nn.init.constant_(alpha, 1.0)
    alpha = jnp.ones((1, 1, 1), dtype=jnp.float32)

    # Example input spanning values below min_val and above max_val
    x = jax.random.normal(key, (B, T, C), dtype=jnp.float32) * 2.0

    out = scaler_forward(x, alpha, min_val=0.0, max_val=1.0)
    out = jax.block_until_ready(out)

    # Reference check in plain JAX (same semantics as the PyTorch forward)
    ref = jnp.clip(x / jnp.maximum(alpha, FLOAT_EPS), 0.0, 1.0)
    assert out.shape == (B, T, C)
    assert jnp.allclose(out, ref, atol=1e-6, rtol=1e-6)

    # Second check with a non-trivial alpha (reciprocal-vs-divide low-bit diff
    # is well within tolerance, and clamped values match exactly).
    alpha2 = jnp.full((1, 1, 1), 3.0, dtype=jnp.float32)
    out2 = jax.block_until_ready(scaler_forward(x, alpha2, min_val=0.0, max_val=1.0))
    ref2 = jnp.clip(x / jnp.maximum(alpha2, FLOAT_EPS), 0.0, 1.0)
    assert jnp.allclose(out2, ref2, atol=1e-6, rtol=1e-6)

    print("KERNEL_OK")
</pallas_src>

<mosaic_0001>
module attributes {stable_mosaic.version = 11 : i64} {
  func.func @scaler_kernel(%arg0: i32, %arg1: memref<1xf32, #tpu.memory_space<smem>>, %arg2: memref<1x512xf32, #tpu.memory_space<vmem>>, %arg3: memref<1x512xf32, #tpu.memory_space<vmem>>) attributes {dimension_semantics = [#tpu.dimension_semantics<parallel>], iteration_bounds = array<i64: 1>, scalar_prefetch = 0 : i64, scratch_operands = 0 : i64, tpu.core_type = #tpu.core_type<tc>, window_params = [{transform_indices = @transform_0, window_bounds = array<i64: 1>}, {transform_indices = @transform_1, window_bounds = array<i64: 1, 512>}, {transform_indices = @transform_2, window_bounds = array<i64: 1, 512>}]} {
    %c0 = arith.constant 0 : index
    %0 = memref.load %arg1[%c0] : memref<1xf32, #tpu.memory_space<smem>>
    %cst = arith.constant 1.1920929E-7 : f32
    %1 = arith.maximumf %0, %cst : f32
    %cst_0 = arith.constant 1.000000e+00 : f32
    %2 = arith.divf %cst_0, %1 : f32
    %c0_1 = arith.constant 0 : index
    %c0_2 = arith.constant 0 : index
    %3 = vector.load %arg2[%c0_1, %c0_2] : memref<1x512xf32, #tpu.memory_space<vmem>>, vector<1x512xf32>
    %4 = vector.broadcast %2 : f32 to vector<1x512xf32>
    %5 = arith.mulf %3, %4 : vector<1x512xf32>
    %cst_3 = arith.constant 0.000000e+00 : f32
    %cst_4 = arith.constant 1.000000e+00 : f32
    %6 = vector.broadcast %cst_3 : f32 to vector<1x512xf32>
    %7 = arith.maximumf %6, %5 : vector<1x512xf32>
    %8 = vector.broadcast %cst_4 : f32 to vector<1x512xf32>
    %9 = arith.minimumf %8, %7 : vector<1x512xf32>
    %c0_5 = arith.constant 0 : index
    %c0_6 = arith.constant 0 : index
    %10 = vector.load %arg3[%c0_5, %c0_6] : memref<1x512xf32, #tpu.memory_space<vmem>>, vector<1x512xf32>
    tpu.vector_store %arg3[%c0_5, %c0_6], %9 {strides = array<i32>} : memref<1x512xf32, #tpu.memory_space<vmem>>, vector<1x512xf32>,
    return
  }
  func.func @transform_0(%arg0: i32) -> i32 {
    %c0_i32 = arith.constant 0 : i32
    %c0_i32_0 = arith.constant 0 : i32
    return %c0_i32 : i32
  }
  func.func @transform_1(%arg0: i32) -> (i32, i32) {
    %c0_i32 = arith.constant 0 : i32
    %c0_i32_0 = arith.constant 0 : i32
    return %arg0, %c0_i32 : i32, i32
  }
  func.func @transform_2(%arg0: i32) -> (i32, i32) {
    %c0_i32 = arith.constant 0 : i32
    %c0_i32_0 = arith.constant 0 : i32
    return %arg0, %c0_i32 : i32, i32
  }
}

</mosaic_0001>

<bundles_post_ra>
// kernel: tpu_custom_call.1
= control target key start
LH: loop header
LB: loop body
LE: loop exit
PB: predicated region body
PF: predicated region fallthrough
CT: control target
= control target key end

     0   :  { %8 = vsyncpa [#allocation4], 0  ;;  %s155_s0 = inlined_call_operand.<no memory space> [shape: f32[1], index: 0, kind: input, shape index: {}]   ;;  %s156_s1 = inlined_call_operand.hbm [shape: f32[1,512], index: 1, kind: input, shape index: {}]   ;;  %s157_s2 = inlined_call_operand.hbm [shape: f32[1,512], index: 2, kind: output, shape index: {}]  }
   0x1   :  { %9 = vsyncpa [#allocation5], 0  ;;  %s110_s9 = smov [#allocation3]   ;;  %s62_s13 = scalar_lea.hbm %s156_s1, 64 }
   0x2   :  { %s18_s10 = sshll.u32 %s110_s9, 4  ;;  %p63_p0 = scmp.ne.s32.totalorder %s156_s1, %s62_s13  ;;  %s19_s10 = int_to_ptr.vmem [resolvable:$true] %s18_s10 }
   0x3   :  { %p66_p1 = scmp.lt.u32.totalorder %s62_s13, %s156_s1 }
   0x5   :  { %p68_p2 = pnand %p66_p1, %p63_p0 }
   0x7   :  { %71 = shalt.err (!%p68_p2)
}
   0x8   :  { %s72_s18 = scalar_lea.vmem %s19_s10, 64  ;;  %p77_p4 = scmp.lt.s32.totalorder %s19_s10, %s19_s10 }
   0x9   :  { %p73_p3 = scmp.ne.s32.totalorder %s19_s10, %s72_s18  ;;  %p78_p5 = scmp.lt.s32.totalorder %s72_s18, %s72_s18 }
   0xb   :  { %p79_p6 = por %p78_p5, %p77_p4 }
   0xd   :  { %p80_p7 = pnand %p79_p6, %p73_p3 }
   0xf   :  { %83 = shalt.err (!%p80_p7)
}
  0x10   :  { %21 = dma.hbm_to_vmem [thread:$0]  %s156_s1, 64, %s19_s10, [#allocation4]  }
  0x11   :  { %106 = dma.done.wait [#allocation4], 64  }
  0x12   :  { %107 = vsyncadd [#allocation4], 4294967232  ;;  %s111_s21 = smov 1.1920929e-07   ;;  %v30_v2 = vld [vmem:[#allocation3] sm:$0xf]  ;;  %v35_v4 = vlaneseq  ;;  %s112_s26 = smov [#allocation6]  }
  0x13   :  { %s26_s24 = smax.f32 %s111_s21, %s155_s0  ;;  %s46_s27 = sshll.u32 %s112_s26, 4  ;;  %s47_s27 = int_to_ptr.vmem [resolvable:$true] %s46_s27 }
  0x14   :  { %v27_v0 = vstv %s26_s24  ;;  %vm37_vm0 = vcmp.lt.s32.totalorder %v35_v4, 512  ;;  %s84_s1 = scalar_lea.vmem %s47_s27, 64  ;;  %p89_p9 = scmp.lt.s32.totalorder %s47_s27, %s47_s27 }
  0x15   :  { %60 = vrcp.f32 %v27_v0  ;;  %p85_p8 = scmp.ne.s32.totalorder %s47_s27, %s84_s1  ;;  %p90_p10 = scmp.lt.s32.totalorder %s84_s1, %s84_s1 }
  0x17   :  { %p91_p11 = por %p90_p10, %p89_p9 }
  0x19   :  { %p92_p12 = pnand %p91_p11, %p85_p8 }
  0x1f   :  { %v61_v1 = vpop.eup %60 }
  0x20   :  { %55 = vpush %v61_v1 }
  0x51   :  { %s56_s25 = spop %55 }
  0x52   :  { %v31_v3 = vstv %s56_s25 }
  0x53   :  { %v32_v5 = vmul.f32 %v31_v3, %v30_v2 }
  0x55   :  { %v33_v6 = vmax.f32 %v32_v5, 0.0 }
  0x57   :  { %v34_v7 = vmin.f32 %v33_v6, 1.0 }
  0x59   :  { %39 = vst.msk [vmem:[#allocation6] sm:$0xf] %vm37_vm0, %v34_v7 }
  0x5a   :  { %95 = shalt.err (!%p92_p12)
}
  0x5b   :  { %s96_s29 = scalar_lea.hbm %s157_s2, 64 }
  0x5c   :  { %p97_p13 = scmp.ne.s32.totalorder %s157_s2, %s96_s29  ;;  %p100_p0 = scmp.lt.u32.totalorder %s96_s29, %s157_s2 }
  0x5e   :  { %p102_p1 = pnand %p100_p0, %p97_p13 }
  0x60   :  { %105 = shalt.err (!%p102_p1)
}
  0x61   :  { %49 = dma.vmem_to_hbm [thread:$0]  %s47_s27, 64, %s157_s2, [#allocation5]  }
  0x62   :  { %108 = dma.done.wait [#allocation5], 64  }
  0x63   :  { %109 = vsyncadd [#allocation5], 4294967232 }
  0x64   :  { %53 = vsyncpa [#allocation4], 1 }
  0x65   :  { %54 = vsyncpa [#allocation5], 1 }

</bundles_post_ra>
